<compile_context>
chip_gen: v5e
topology: v5e:2x2
jax: 0.10.0
libtpu: 0.0.40
codegen_flags: <defaults>
</compile_context>

<pallas_src>
import functools
import math

import jax
import jax.numpy as jnp
from jax.experimental import pallas as pl
from jax.experimental.pallas import tpu as pltpu


def _round_up(x, m):
    return (x + m - 1) // m * m


def _pick_tile(dim, requested, align):
    """Largest multiple of `align` that divides `dim` and is <= requested."""
    requested = max(requested, align)
    best = align
    t = align
    while t <= min(requested, dim):
        if dim % t == 0:
            best = t
        t += align
    return best


# --------------------------------------------------------------------------
# Fast path: no K grid axis.  LHS row-slab (tm, Dp) is resident, weight column
# slab (Dp, tn) is resident, residual comes from the LHS slab itself.
# --------------------------------------------------------------------------
def _residual_dense_fast_kernel(x_ref, w_ref, b_ref, o_ref, *, tn, compute_dtype):
    j = pl.program_id(1)
    x = x_ref[...]                                         # (tm, Dp), original dtype
    lhs = x if compute_dtype is None else x.astype(compute_dtype)
    acc = jnp.dot(lhs, w_ref[...], preferred_element_type=jnp.float32)
    # Residual from the already-resident LHS tile (x is read from HBM once).
    res = x_ref[:, pl.ds(pl.multiple_of(j * tn, 128), tn)]
    o_ref[...] = (acc + b_ref[...] + res).astype(o_ref.dtype)


# --------------------------------------------------------------------------
# Fallback path (very large D): (M, N, K) tiling with an f32 VMEM accumulator.
# Requires tn == tk so the residual can be folded in at the k == j step.
# --------------------------------------------------------------------------
def _residual_dense_kacc_kernel(x_ref, w_ref, b_ref, o_ref, acc_ref, *, compute_dtype):
    j = pl.program_id(1)
    k = pl.program_id(2)
    x = x_ref[...]                                         # (tm, tk), original dtype
    lhs = x if compute_dtype is None else x.astype(compute_dtype)
    prod = jnp.dot(lhs, w_ref[...], preferred_element_type=jnp.float32)

    @pl.when(k == 0)
    def _first():
        acc_ref[...] = prod                                # no zero-init pass

    @pl.when(k > 0)
    def _rest():
        acc_ref[...] += prod

    # Fold residual at the K step whose columns match this output tile,
    # using the resident LHS tile in its original (full-precision) dtype.
    @pl.when(k == j)
    def _residual():
        acc_ref[...] += x.astype(jnp.float32)

    @pl.when(k == pl.num_programs(2) - 1)
    def _finalize():
        o_ref[...] = (acc_ref[...] + b_ref[...]).astype(o_ref.dtype)


def residual_dense(x, w, b, *, tm=512, tn=512, compute_dtype=None,
                   use_fast_path=None, vmem_limit_bytes=None):
    """Residual(Linear)(x) == x @ w + b + x, fused in one Pallas TPU kernel.

    x: (..., D);  w: (D, D) = torch nn.Linear.weight.T;  b: (D,)
    compute_dtype: optional (e.g. jnp.bfloat16) dtype for the MXU operands;
        accumulation, bias and residual stay full precision.  For best perf,
        pre-cast w to compute_dtype once at parameter setup.
    """
    *lead, D = x.shape
    assert w.shape == (D, D), "Residual requires fn: (..., D) -> (..., D)"
    assert b.shape == (D,)
    M = math.prod(lead) if lead else 1
    out_dtype = x.dtype

    x2 = x.reshape(M, D)

    # ---- lane / reduction-dim padding (required for the zero-padded K sum).
    #      M is NOT padded: the boundary row block is partial & masked. ----
    Dp = _round_up(D, 256) if D >= 512 else _round_up(D, 128)
    if Dp != D:
        x2 = jnp.pad(x2, ((0, 0), (0, Dp - D)))
        w = jnp.pad(w, ((0, Dp - D), (0, Dp - D)))
        b = jnp.pad(b, ((0, Dp - D),))
    b2 = b.reshape(1, Dp)

    if compute_dtype is not None and w.dtype != compute_dtype:
        # Better hoisted to parameter setup; kept here for a self-contained API.
        w = w.astype(compute_dtype)

    # ---- tile selection ----
    m_align = 16 if compute_dtype == jnp.bfloat16 else 8
    tm = max(m_align, min(_round_up(tm, m_align), _round_up(M, m_align)))
    grid_m = pl.cdiv(M, tm)

    tn = _pick_tile(Dp, tn, 128)
    # Keep >= 2 blocks across the parallel axes when possible (v7x has 2 TCs).
    if grid_m * (Dp // tn) < 2 and Dp % 256 == 0 and tn == Dp:
        tn = Dp // 2
    grid_n = Dp // tn

    xb = jnp.dtype(x2.dtype).itemsize
    wb = jnp.dtype(w.dtype).itemsize
    bb = jnp.dtype(b2.dtype).itemsize
    ob = jnp.dtype(out_dtype).itemsize

    # ---- VMEM capacity with headroom for compiler scratch / semaphores ----
    try:
        phys_vmem = getattr(pltpu.get_tpu_info(), "vmem_capacity_bytes", None)
    except Exception:
        phys_vmem = None
    if not phys_vmem:
        phys_vmem = 64 * 1024 * 1024            # conservative (v7x per-TC)
    budget = int(0.80 * phys_vmem)

    # Fast-path estimate: double-buffered (tm, Dp) LHS + (Dp, tn) weight slab
    # + bias, plus double-buffered output tiles.
    fast_est = 2 * (tm * Dp * xb + Dp * tn * wb + tn * bb) + 2 * tm * tn * ob
    if use_fast_path is None:
        use_fast_path = fast_est <= budget

    if use_fast_path:
        grid = (grid_m, grid_n)
        kernel = functools.partial(_residual_dense_fast_kernel,
                                   tn=tn, compute_dtype=compute_dtype)
        in_specs = [
            pl.BlockSpec((tm, Dp), lambda i, j: (i, 0)),   # x row slab (full K)
            pl.BlockSpec((Dp, tn), lambda i, j: (0, j)),   # weight column slab
            pl.BlockSpec((1, tn), lambda i, j: (0, j)),    # bias tile
        ]
        out_specs = pl.BlockSpec((tm, tn), lambda i, j: (i, j))
        scratch_shapes = []
        dims = ("parallel", "parallel")
        vmem_est = fast_est
        lhs_reads = 1
    else:
        tk = tn                                  # residual fold needs tn == tk
        grid_k = Dp // tk
        grid = (grid_m, grid_n, grid_k)
        kernel = functools.partial(_residual_dense_kacc_kernel,
                                   compute_dtype=compute_dtype)
        in_specs = [
            pl.BlockSpec((tm, tk), lambda i, j, k: (i, k)),
            pl.BlockSpec((tk, tn), lambda i, j, k: (k, j)),
            pl.BlockSpec((1, tn), lambda i, j, k: (0, j)),
        ]
        out_specs = pl.BlockSpec((tm, tn), lambda i, j, k: (i, j))
        scratch_shapes = [pltpu.VMEM((tm, tn), jnp.float32)]
        dims = ("parallel", "parallel", "arbitrary")
        vmem_est = (2 * (tm * tk * xb + tk * tn * wb + tn * bb + tm * tn * ob)
                    + tm * tn * 4)
        lhs_reads = grid_n

    if vmem_limit_bytes is None:
        vmem_limit_bytes = min(int(0.85 * phys_vmem),
                               max(2 * vmem_est, 32 * 1024 * 1024))

    cost = pl.CostEstimate(
        flops=2 * M * Dp * Dp + 2 * M * Dp,
        transcendentals=0,
        bytes_accessed=(lhs_reads * M * Dp * xb       # x (incl. any N re-read)
                        + grid_m * Dp * Dp * wb       # W re-read over M tiles
                        + grid_m * Dp * bb
                        + M * Dp * ob),
    )

    out = pl.pallas_call(
        kernel,
        out_shape=jax.ShapeDtypeStruct((M, Dp), out_dtype),
        grid_spec=pltpu.PrefetchScalarGridSpec(
            num_scalar_prefetch=0,
            grid=grid,
            in_specs=in_specs,
            out_specs=out_specs,
            scratch_shapes=scratch_shapes,
        ),
        compiler_params=pltpu.CompilerParams(
            dimension_semantics=dims,
            vmem_limit_bytes=int(vmem_limit_bytes),
        ),
        cost_estimate=cost,
    )(x2, w, b2)

    if Dp != D:
        out = out[:, :D]
    return out.reshape(*lead, D) if lead else out.reshape(D)


if __name__ == "__main__":
    B, S, D = 2, 8, 256

    key = jax.random.PRNGKey(0)
    kx, kw, kb = jax.random.split(key, 3)
    x = jax.random.normal(kx, (B, S, D), dtype=jnp.float32)
    # Synthetic Linear(D, D) params; w is stored (D_in, D_out) = torch weight.T
    w = jax.random.normal(kw, (D, D), dtype=jnp.float32) * (1.0 / jnp.sqrt(D))
    b = jax.random.normal(kb, (D,), dtype=jnp.float32) * 0.1

    # Reference: fn(x) + x in plain JAX (high-precision matmul).
    y_ref = jnp.einsum("bsd,de->bse", x, w, precision="highest") + b + x

    # 1) fast path (no K axis, W-column-resident, residual from LHS slab), f32.
    y = jax.block_until_ready(residual_dense(x, w, b))
    assert y.shape == (B, S, D)
    assert jnp.allclose(y, y_ref, atol=2e-2, rtol=2e-2)

    # 2) K-tiled fallback path (accumulator + residual fold at k == j).
    y_k = jax.block_until_ready(
        residual_dense(x, w, b, tm=8, tn=128, use_fast_path=False))
    assert jnp.allclose(y_k, y_ref, atol=2e-2, rtol=2e-2)

    # 3) bf16 MXU operands with f32 accumulation / full-precision residual.
    y_bf = jax.block_until_ready(
        residual_dense(x, w, b, compute_dtype=jnp.bfloat16))
    assert jnp.allclose(y_bf, y_ref, atol=1e-1, rtol=1e-1)

    print("KERNEL_OK")
</pallas_src>

<mosaic_0001>
module attributes {stable_mosaic.version = 11 : i64} {
  func.func @_residual_dense_fast_kernel(%arg0: i32, %arg1: i32, %arg2: memref<16x256xf32, #tpu.memory_space<vmem>>, %arg3: memref<256x128xf32, #tpu.memory_space<vmem>>, %arg4: memref<1x128xf32, #tpu.memory_space<vmem>>, %arg5: memref<16x128xf32, #tpu.memory_space<vmem>>) attributes {dimension_semantics = [#tpu.dimension_semantics<parallel>, #tpu.dimension_semantics<parallel>], iteration_bounds = array<i64: 1, 2>, scalar_prefetch = 0 : i64, scratch_operands = 0 : i64, tpu.core_type = #tpu.core_type<tc>, window_params = [{transform_indices = @transform_0, window_bounds = array<i64: 16, 256>}, {transform_indices = @transform_1, window_bounds = array<i64: 256, 128>}, {transform_indices = @transform_2, window_bounds = array<i64: 1, 128>}, {transform_indices = @transform_3, window_bounds = array<i64: 16, 128>}]} {
    %c0 = arith.constant 0 : index
    %c0_0 = arith.constant 0 : index
    %0 = vector.load %arg2[%c0, %c0_0] : memref<16x256xf32, #tpu.memory_space<vmem>>, vector<16x256xf32>
    %c0_1 = arith.constant 0 : index
    %c0_2 = arith.constant 0 : index
    %1 = vector.load %arg3[%c0_1, %c0_2] : memref<256x128xf32, #tpu.memory_space<vmem>>, vector<256x128xf32>
    %cst = arith.constant dense<0.000000e+00> : vector<16x128xf32>
    %2 = tpu.matmul %0, %1, %cst {dimension_numbers = #tpu.dot_dimension_numbers<[1], [0], [0], [1], [0, 0, 1, 1], [], []>} : vector<16x256xf32>, vector<256x128xf32>, vector<16x128xf32> -> vector<16x128xf32>
    %c128_i32 = arith.constant 128 : i32
    %3 = arith.muli %arg1, %c128_i32 : i32
    %4 = tpu.assume_multiple %3, 128 : i32
    %c0_3 = arith.constant 0 : index
    %5 = arith.index_cast %4 : i32 to index
    %6 = vector.load %arg2[%c0_3, %5] : memref<16x256xf32, #tpu.memory_space<vmem>>, vector<16x128xf32>
    %c0_4 = arith.constant 0 : index
    %c0_5 = arith.constant 0 : index
    %7 = vector.load %arg4[%c0_4, %c0_5] : memref<1x128xf32, #tpu.memory_space<vmem>>, vector<1x128xf32>
    %8 = vector.broadcast %7 : vector<1x128xf32> to vector<16x128xf32>
    %9 = arith.addf %2, %8 : vector<16x128xf32>
    %10 = arith.addf %9, %6 : vector<16x128xf32>
    %c0_6 = arith.constant 0 : index
    %c0_7 = arith.constant 0 : index
    %11 = vector.load %arg5[%c0_6, %c0_7] : memref<16x128xf32, #tpu.memory_space<vmem>>, vector<16x128xf32>
    tpu.vector_store %arg5[%c0_6, %c0_7], %10 {strides = array<i32>} : memref<16x128xf32, #tpu.memory_space<vmem>>, vector<16x128xf32>,
    return
  }
  func.func @transform_0(%arg0: i32, %arg1: i32) -> (i32, i32) {
    %c0_i32 = arith.constant 0 : i32
    %c0_i32_0 = arith.constant 0 : i32
    return %arg0, %c0_i32 : i32, i32
  }
  func.func @transform_1(%arg0: i32, %arg1: i32) -> (i32, i32) {
    %c0_i32 = arith.constant 0 : i32
    %c0_i32_0 = arith.constant 0 : i32
    return %c0_i32, %arg1 : i32, i32
  }
  func.func @transform_2(%arg0: i32, %arg1: i32) -> (i32, i32) {
    %c0_i32 = arith.constant 0 : i32
    %c0_i32_0 = arith.constant 0 : i32
    return %c0_i32, %arg1 : i32, i32
  }
  func.func @transform_3(%arg0: i32, %arg1: i32) -> (i32, i32) {
    %c0_i32 = arith.constant 0 : i32
    return %arg0, %arg1 : i32, i32
  }
}

</mosaic_0001>

<bundles_post_ra>
// kernel: tpu_custom_call.1
= control target key start
LH: loop header
LB: loop body
LE: loop exit
PB: predicated region body
PF: predicated region fallthrough
CT: control target
= control target key end

     0   :  { %8 = vsyncpa [#allocation3], 0  ;;  %s1049_s0 = inlined_call_operand.hbm [shape: f32[16,256], index: 0, kind: input, shape index: {}]   ;;  %s1050_s1 = inlined_call_operand.hbm [shape: f32[256,256], index: 1, kind: input, shape index: {}]   ;;  %s1051_s2 = inlined_call_operand.hbm [shape: f32[1,256], index: 2, kind: input, shape index: {}]   ;;  %s1052_s3 = inlined_call_operand.hbm [shape: f32[16,256], index: 3, kind: output, shape index: {}]  }
   0x1   :  { %9 = vsyncpa [#allocation6], 0 }
   0x2   :  { %11 = vsyncpa [#allocation6 + $0x1], 0 }
   0x3   :  { %12 = vsyncpa [#allocation4], 0 }
   0x4   :  { %14 = vsyncpa [#allocation4 + $0x1], 0  ;;  %s835_s12 = smov 0   ;;  %s837_s13 = smov 0  }
   0x5   :  { %s839_s14 = smov 0   ;;  %s841_s15 = smov 0  }
   0x6   :  { %s843_s16 = smov 0   ;;  %s845_s17 = smov 0  }
   0x7 LB: > { %s29_s18 = sadd.s32 1, %s801_s16  ;;  %s65_s19 = sadd.s32 1, %s793_s14  ;;  %s805_s17 = sphi %s845_s17, %s20_s17   ;;  %s801_s16 = sphi %s843_s16, %s1063_s16   ;;  %s797_s15 = sphi %s841_s15, %s1062_s15   ;;  %s793_s14 = sphi %s839_s14, %s1061_s14   ;;  %s789_s13 = sphi %s837_s13, %s1060_s13   ;;  %s785_s12 = sphi %s835_s12, %s1059_s12  }
   0x8   : > { %p30_p0 = scmp.ge.s32.totalorder %s29_s18, 2  ;;  %p72_p1 = scmp.ne.s32.totalorder %s793_s14, %s789_s13 }
   0x9   : > { %p73_p2 = scmp.eq.s32.totalorder %s805_s17, 0  ;;  %p498_p4 = scmp.ge.s32.totalorder %s805_s17, 2 }
   0xa   : > { %s1065_s18 = smov (%p30_p0, %s29_s18), 0  ;;  %p569_p5 = scmp.lt.s32.totalorder %s805_s17, 2 }
   0xb   : > { %p875_p3 = por %p73_p2, %p72_p1  ;;  %s62_s21 = ssub.s32 %s801_s16, %s1065_s18 }
   0xc   : > { %p63_p6 = scmp.eq.s32.totalorder %s62_s21, 0  ;;  %s174_s22 = sand.u32 1, %s805_s17  }
   0xd   : > { %s176_s23 = sand.u32 1, %s793_s14   ;;  %s500_s26 = sshll.u32 %s801_s16, 3 }
   0xe   : > { %s886_s24 = scalar_select %p63_p6, %s793_s14, %s65_s19  }
   0xf   : > { %s499_s25 = sshll.u32 %s176_s23, 8  ;;  %s182_s29 = scalar_lea.hbm %s1050_s1, %s500_s26 }
  0x10   : > { %s183_s30 = sshll.u32 %s182_s29, 4  ;;  %s178_s4 = scalar_lea.vmem [#allocation5], %s499_s25  ;;  %s184_s30 = int_to_ptr.hbm [resolvable:$true] %s183_s30 }
  0x11   : > { %s185_s5 = sshll.u32 %s178_s4, 4  ;;  %p898_p7 = pnand %p569_p5, %p875_p3  ;;  %s186_s5 = int_to_ptr.vmem [resolvable:$true] %s185_s5 }
  0x12   : > { %s902_s7 = scalar_lea.sflag [#allocation6], %s174_s22  ;;  %s807_s8 = smov 256  }
  0x13   : > { %s808_s9 = smov 128   ;;  %s809_s10 = smov 8  }
  0x14   : > { %560 = dma.hbm_to_vmem [thread:$0]  (!%p898_p7), %s184_s30, 4096, %s186_s5, %s902_s7, %s807_s8, %s808_s9, %s809_s10  }
  0x15   : > { %s909_s11 = sadd.s32 4294967295, %s805_s17   ;;  %s495_s19 = sadd.s32 4294967294, %s805_s17  }
  0x16   : > { %p78_p8 = scmp.ne.s32.totalorder %s789_s13, %s785_s12  ;;  %p79_p9 = scmp.eq.s32.totalorder %s909_s11, 0 }
  0x17   : > { %p130_p10 = scmp.eq.s32.totalorder %s909_s11, 1  ;;  %p136_p11 = scmp.eq.s32.totalorder %s495_s19, 1 }
  0x18   : > { %p918_p12 = por %p79_p9, %p78_p8  ;;  %p496_p13 = scmp.ge.s32.totalorder %s805_s17, 1 }
  0x19   : > { %p926_p0 = por %p130_p10, %p72_p1  ;;  %p930_p2 = por %p136_p11, %p78_p8 }
  0x1a   : > { %p143_p3 = scmp.lt.s32.totalorder %s805_s17, 3  ;;  %s158_s27 = sshll.u32 %s1049_s0, 4  ;;  %s159_s27 = int_to_ptr.hbm [resolvable:$true] %s158_s27 }
  0x1b   : > { %s810_s29 = smov [#allocation2]   ;;  %s201_s9 = scalar_lea.hbm %s1051_s2, %s801_s16 }
  0x1c   : > { %p938_p5 = pnand %p496_p13, %p143_p3  ;;  %s160_s30 = sshll.u32 %s810_s29, 4  ;;  %s161_s30 = int_to_ptr.vmem [resolvable:$true] %s160_s30 }
  0x1d   : > { %s203_s10 = sshll.u32 %s201_s9, 4  ;;  %s198_s19 = scalar_lea.vmem [#allocation7], %s176_s23  ;;  %s204_s10 = int_to_ptr.hbm [resolvable:$true] %s203_s10 }
  0x1e   : > { %p553_p1 = pneg %p938_p5  ;;  %s205_s25 = sshll.u32 %s198_s19, 4  ;;  %s206_s25 = int_to_ptr.vmem [resolvable:$true] %s205_s25 }
  0x1f   : > { %s811_s26 = smov 16   ;;  %214 = sbr.rel (%p938_p5) target bundleno = 216 (0xd8), region = 32 }
  0x20   : > { %p554_p6 = pnand %p553_p1, %p79_p9 }
  0x21   : > { %563 = dma.hbm_to_vmem [thread:$0]  (!%p898_p7), %s204_s10, 16, %s206_s25, %s902_s7  }
  0x22   : > { %556 = dma.hbm_to_vmem [thread:$0]  (!%p554_p6), %s159_s27, 512, %s161_s30, [#allocation3], %s807_s8, %s807_s8, %s811_s26  }
  0x24   : > { %772 = dma.done.wait (%p79_p9), [#allocation3], 512  }
  0x25   : > { %774 = vsyncadd (%p79_p9), [#allocation3], 4294966784  ;;  %s221_s23 = sand.u32 1, %s909_s11   ;;  %s965_s29 = sand.u32 1, %s789_s13  }
  0x26   : > { %s503_s4 = sshll.u32 %s965_s29, 8  ;;  %s222_s8 = scalar_lea.sflag [#allocation6], %s221_s23 }
  0x27   : > { %s968_s6 = scalar_lea.vmem [#allocation5], %s503_s4 }
  0x28   : > { %776 = dma.done.wait (%p918_p12), %s222_s8, 4112  }
  0x29   : > { %778 = vsyncadd (%p918_p12), %s222_s8, 4294963184  ;;  %v283_v0 = vld [vmem:[%s968_s6 + $0x78] sm:$0xff]  ;;  %v282_v1 = vld [vmem:[%s968_s6 + $0x70] sm:$0xff]  ;;  %s234_s7 = scalar_lea.vmem [#allocation7], %s965_s29  ;;  %s505_s11 = sshll.u32 %s797_s15, 7 }
  0x2a   : > { %v299_v2 = vld [vmem:[%s968_s6 + $0xf8] sm:$0xff]  ;;  %511 = vmatpush.msra.mxu2 %v283_v0  ;;  %v298_v3 = vld [vmem:[%s968_s6 + $0xf0] sm:$0xff]  ;;  %v281_v4 = vld [vmem:[%s968_s6 + $0x68] sm:$0xff]  ;;  %311 = vmatpush.msra.mxu0 %v283_v0  ;;  %s301_s20 = sshra.s32 %s505_s11, 7  ;;  %s504_s28 = sshll.u32 %s965_s29, 4 }
  0x2b   : > { %527 = vmatpush.msra.mxu3 %v299_v2  ;;  %v297_v5 = vld [vmem:[%s968_s6 + $0xe8] sm:$0xff]  ;;  %334 = vmatpush.msra.mxu1 %v299_v2  ;;  %v280_v6 = vld [vmem:[%s968_s6 + $0x60] sm:$0xff]  ;;  %v279_v8 = vld [vmem:[%s968_s6 + $0x58] sm:$0xff]  ;;  %s506_s27 = sshll.u32 %s301_s20, 3  ;;  %s508_s30 = sshll.u32 %s797_s15, 3 }
  0x2c   : > { %512 = vmatpush.msra.mxu2 %v282_v1  ;;  %312 = vmatpush.msra.mxu0 %v282_v1  ;;  %v296_v7 = vld [vmem:[%s968_s6 + $0xe0] sm:$0xff]  ;;  %v295_v9 = vld [vmem:[%s968_s6 + $0xd8] sm:$0xff]  ;;  %v278_v10 = vld [vmem:[%s968_s6 + $0x50] sm:$0xff]  ;;  %s304_s5 = scalar_lea.vmem [#allocation2], %s506_s27  ;;  %s375_s19 = scalar_lea.hbm %s1052_s3, %s508_s30 }
  0x2d   : > { %528 = vmatpush.msra.mxu3 %v298_v3  ;;  %335 = vmatpush.msra.mxu1 %v298_v3  ;;  %v294_v11 = vld [vmem:[%s968_s6 + $0xd0] sm:$0xff]  ;;  %v277_v12 = vld [vmem:[%s968_s6 + $0x48] sm:$0xff]  ;;  %v276_v14 = vld [vmem:[%s968_s6 + $0x40] sm:$0xff]  ;;  %s261_s25 = scalar_lea.vmem [#allocation8], %s504_s28  ;;  %s378_s23 = sshll.u32 %s375_s19, 4  ;;  %s379_s23 = int_to_ptr.hbm [resolvable:$true] %s378_s23 }
  0x2e   : > { %513 = vmatpush.msra.mxu2 %v281_v4  ;;  %313 = vmatpush.msra.mxu0 %v281_v4  ;;  %v293_v13 = vld [vmem:[%s968_s6 + $0xc8] sm:$0xff]  ;;  %v292_v15 = vld [vmem:[%s968_s6 + $0xc0] sm:$0xff]  ;;  %v275_v16 = vld [vmem:[%s968_s6 + $0x38] sm:$0xff]  ;;  %s376_s26 = sshll.u32 %s261_s25, 4  ;;  %s362_s15 = scalar_lea.sflag [#allocation4], %s965_s29  ;;  %s377_s26 = int_to_ptr.vmem [resolvable:$true] %s376_s26 }
  0x2f   : > { %529 = vmatpush.msra.mxu3 %v297_v5  ;;  %336 = vmatpush.msra.mxu1 %v297_v5  ;;  %v291_v17 = vld [vmem:[%s968_s6 + $0xb8] sm:$0xff]  ;;  %v274_v18 = vld [vmem:[%s968_s6 + $0x30] sm:$0xff]  ;;  %v273_v20 = vld [vmem:[%s968_s6 + $0x28] sm:$0xff]  ;;  %s733_s4 = sshra.s32 %s379_s23, 4  ;;  %s739_s11 = scalar_lea.hbm %s1052_s3, 32  ;;  %s734_s4 = int_to_ptr.hbm [resolvable:$true] %s733_s4 }
  0x30   : > { %514 = vmatpush.msra.mxu2 %v280_v6  ;;  %314 = vmatpush.msra.mxu0 %v280_v6  ;;  %v290_v19 = vld [vmem:[%s968_s6 + $0xb0] sm:$0xff]  ;;  %v289_v21 = vld [vmem:[%s968_s6 + $0xa8] sm:$0xff]  ;;  %v272_v22 = vld [vmem:[%s968_s6 + $0x20] sm:$0xff]  ;;  %s735_s8 = scalar_lea.hbm %s734_s4, 16  ;;  %p740_p10 = scmp.lt.s32.totalorder %s734_s4, %s1052_s3 }
  0x31   : > { %530 = vmatpush.msra.mxu3 %v296_v7  ;;  %337 = vmatpush.msra.mxu1 %v296_v7  ;;  %v288_v23 = vld [vmem:[%s968_s6 + $0xa0] sm:$0xff]  ;;  %v271_v24 = vld [vmem:[%s968_s6 + $0x18] sm:$0xff]  ;;  %v270_v26 = vld [vmem:[%s968_s6 + $0x10] sm:$0xff]  ;;  %p736_p7 = scmp.ne.s32.totalorder %s734_s4, %s735_s8  ;;  %p741_p11 = scmp.lt.s32.totalorder %s739_s11, %s735_s8 }
  0x32   : > { %515 = vmatpush.msra.mxu2 %v279_v8  ;;  %315 = vmatpush.msra.mxu0 %v279_v8  ;;  %v287_v25 = vld [vmem:[%s968_s6 + $0x98] sm:$0xff]  ;;  %v286_v27 = vld [vmem:[%s968_s6 + $0x90] sm:$0xff]  ;;  %v269_v28 = vld [vmem:[%s968_s6 + $0x8] sm:$0xff] }
  0x33   : > { %531 = vmatpush.msra.mxu3 %v295_v9  ;;  %338 = vmatpush.msra.mxu1 %v295_v9  ;;  %v285_v29 = vld [vmem:[%s968_s6 + $0x88] sm:$0xff]  ;;  %v268_v30 = vld [vmem:[%s968_s6] sm:$0xff]  ;;  %v266_v32 = vld [vmem:[#allocation2 + $0x10] sm:$0xff]  ;;  %p737_p8 = pnand %p736_p7, %p926_p0  ;;  %p742_p12 = por %p741_p11, %p740_p10 }
  0x34   : > { %516 = vmatpush.msra.mxu2 %v278_v10  ;;  %316 = vmatpush.msra.mxu0 %v278_v10  ;;  %v284_v31 = vld [vmem:[%s968_s6 + $0x80] sm:$0xff]  ;;  %v267_v33 = vld [vmem:[#allocation2 + $0x18] sm:$0xff]  ;;  %v265_v35 = vld [vmem:[#allocation2 + $0x8] sm:$0xff] }
  0x35   : > { %532 = vmatpush.msra.mxu3 %v294_v11  ;;  %339 = vmatpush.msra.mxu1 %v294_v11  ;;  %v264_v34 = vld [vmem:[#allocation2] sm:$0xff]  ;;  %v306_v46 = vld [vmem:[%s304_s5 + $0x10] sm:$0xff]  ;;  %p738_p9 = pneg %p737_p8 }
  0x36   : > { %517 = vmatpush.msra.mxu2 %v277_v12  ;;  %317 = vmatpush.msra.mxu0 %v277_v12  ;;  %v628_v36 = vld [vmem:[%s234_s7] ss:$0 sm:$0xff] }
  0x37   : > { %533 = vmatpush.msra.mxu3 %v293_v13  ;;  %340 = vmatpush.msra.mxu1 %v293_v13  ;;  %v305_v40 = vld [vmem:[%s304_s5] sm:$0xff]  ;;  %p743_p13 = pnand %p742_p12, %p738_p9 }
  0x38   : > { %518 = vmatpush.msra.mxu2 %v276_v14  ;;  %318 = vmatpush.msra.mxu0 %v276_v14 }
  0x39   : > { %534 = vmatpush.msra.mxu3 %v292_v15  ;;  %341 = vmatpush.msra.mxu1 %v292_v15 }
  0x3a   : > { %519 = vmatpush.msra.mxu2 %v275_v16  ;;  %319 = vmatpush.msra.mxu0 %v275_v16 }
  0x3b   : > { %535 = vmatpush.msra.mxu3 %v291_v17  ;;  %342 = vmatpush.msra.mxu1 %v291_v17 }
  0x3c   : > { %520 = vmatpush.msra.mxu2 %v274_v18  ;;  %320 = vmatpush.msra.mxu0 %v274_v18 }
  0x3d   : > { %536 = vmatpush.msra.mxu3 %v290_v19  ;;  %343 = vmatpush.msra.mxu1 %v290_v19 }
  0x3e   : > { %521 = vmatpush.msra.mxu2 %v273_v20  ;;  %321 = vmatpush.msra.mxu0 %v273_v20 }
  0x3f   : > { %537 = vmatpush.msra.mxu3 %v289_v21  ;;  %344 = vmatpush.msra.mxu1 %v289_v21 }
  0x40   : > { %522 = vmatpush.msra.mxu2 %v272_v22  ;;  %322 = vmatpush.msra.mxu0 %v272_v22 }
  0x41   : > { %538 = vmatpush.msra.mxu3 %v288_v23  ;;  %345 = vmatpush.msra.mxu1 %v288_v23 }
  0x42   : > { %523 = vmatpush.msra.mxu2 %v271_v24  ;;  %323 = vmatpush.msra.mxu0 %v271_v24 }
  0x43   : > { %539 = vmatpush.msra.mxu3 %v287_v25  ;;  %346 = vmatpush.msra.mxu1 %v287_v25 }
  0x44   : > { %524 = vmatpush.msra.mxu2 %v270_v26  ;;  %324 = vmatpush.msra.mxu0 %v270_v26 }
  0x45   : > { %540 = vmatpush.msra.mxu3 %v286_v27  ;;  %347 = vmatpush.msra.mxu1 %v286_v27 }
  0x46   : > { %525 = vmatpush.msra.mxu2 %v269_v28  ;;  %325 = vmatpush.msra.mxu0 %v269_v28 }
  0x47   : > { %541 = vmatpush.msra.mxu3 %v285_v29  ;;  %348 = vmatpush.msra.mxu1 %v285_v29 }
  0x48   : > { %526 = vmatpush.msra.mxu2 %v268_v30  ;;  %326 = vmatpush.msra.mxu0 %v268_v30 }
  0x49   : > { %542 = vmatpush.msra.mxu3 %v284_v31  ;;  %330 = vmatmul.f32.vlgmr.msra.gmra.mxu2 %v266_v32 }
  0x4a   : > { %353 = vmatmul.f32.vlgmr.msra.gmra.mxu3 %v267_v33  ;;  %349 = vmatpush.msra.mxu1 %v284_v31 }
  0x4b   : > { %327 = vmatmul.f32.vlgmr.msra.gmra.mxu0 %v264_v34  ;;  %350 = vmatmul.f32.vlgmr.msra.gmra.mxu1 %v265_v35 }
  0xc8   : > { %v328_v37 = vpop.f32.mrf.mxu0  ;;  %v351_v38 = vpop.f32.mrf.mxu1 }
  0xc9   : > { %v329_v39 = vadd.f32 %v628_v36, %v328_v37 }
  0xcb   : > { %v352_v41 = vadd.f32 %v351_v38, %v329_v39 }
  0xcc   : > { %v331_v42 = vpop.f32.mrf.mxu2 }
  0xcd   : > { %v354_v43 = vpop.f32.mrf.mxu3  ;;  %v332_v44 = vadd.f32 %v628_v36, %v331_v42  ;;  %v357_v45 = vadd.f32 %v352_v41, %v305_v40 }
  0xcf   : > { %359 = vst [vmem:[%s261_s25] sm:$0xff] %v357_v45  ;;  %v355_v47 = vadd.f32 %v354_v43, %v332_v44 }
  0xd1   : > { %v358_v48 = vadd.f32 %v355_v47, %v306_v46 }
  0xd3   : > { %360 = vst [vmem:[%s261_s25 + $0x8] sm:$0xff] %v358_v48 }
  0xd4   : > { %746 = shalt.err (!%p743_p13)
}
  0xd5   : > { %s812_s29 = smov 128   ;;  %s813_s28 = smov 256  }
  0xd6   : > { %s814_s30 = smov 8  }
  0xd7   : > { %551 = dma.vmem_to_hbm [thread:$0]  (%p926_p0), %s377_s26, 256, %s379_s23, %s362_s15, %s812_s29, %s813_s28, %s814_s30  }
  0xd8 PF: > { %s393_s5 = sand.u32 1, %s785_s12   ;;  %p565_p3 = pnand %p498_p4, %p930_p2 }
  0xd9   : > { %s394_s9 = scalar_lea.sflag [#allocation4], %s393_s5 }
  0xda   : > { %p566_p5 = pneg %p565_p3 }
  0xdc   : > { %780 = dma.done.wait (%p566_p5), %s394_s9, 256  }
  0xdd   : > { %782 = vsyncadd (%p566_p5), %s394_s9, 4294967040  ;;  %s20_s17 = sadd.s32 1, %s805_s17   ;;  %s1059_s12 = smov %s789_s13 }
  0xde   : > { %p17_p1 = scmp.ge.s32.totalorder %s20_s17, 4   ;;  %s1060_s13 = smov %s793_s14 }
  0xdf   : > { %s1061_s14 = smov %s886_s24  ;;  %s1062_s15 = smov %s801_s16 }
  0xe0   : > { %s1063_s16 = smov %s1065_s18  ;;  %19 = sbr.rel (!%p17_p1) target bundleno = 7 (0x7), region = 95 }
  0xe5   :  { %400 = vsyncpa [#allocation3], 1 }
  0xe6   :  { %402 = vsyncpa [#allocation3 + $0x1], 1 }
  0xe7   :  { %403 = vsyncpa [#allocation6], 1 }
  0xe8   :  { %405 = vsyncpa [#allocation6 + $0x1], 1 }
  0xe9   :  { %406 = vsyncpa [#allocation4], 1 }
  0xea   :  { %408 = vsyncpa [#allocation4 + $0x1], 1 }

</bundles_post_ra>
